<compile_context>
chip_gen: v6e
topology: v6e:2x2x1
jax: 0.10.0
libtpu: 0.0.40
codegen_flags: <defaults>
</compile_context>

<pallas_src>
import math

import jax
import jax.numpy as jnp
from jax import lax
from jax.experimental import pallas as pl
from jax.experimental.pallas import tpu as pltpu


def _tpu_info():
    """Best-effort chip-generation / VMEM-capacity query (safe defaults)."""
    try:
        kind = jax.devices()[0].device_kind.lower()
    except Exception:
        kind = ""
    is_v7 = "v7" in kind
    is_v6 = "v6" in kind
    vmem_cap = 64 * 2 ** 20 if is_v7 else 128 * 2 ** 20
    try:
        vmem_cap = int(pltpu.get_tpu_info().vmem_capacity_bytes)
    except Exception:
        pass
    return {
        "vmem_cap": vmem_cap,
        "bf16_eup": is_v6 or is_v7,   # v5e has no bf16 EUP/VPU
        "two_tc": is_v7,              # v7x: 2 TensorCores per chip
        "is_v7": is_v7,
        "is_v6": is_v6,
    }


def _pick_tile(total, target, aligns):
    """Largest divisor of `total` <= target that is a multiple of one of
    `aligns` (tried in order); falls back to `total` (full-extent block)."""
    if total <= target:
        return total
    for a in aligns:
        t = (target // a) * a
        while t >= a:
            if total % t == 0:
                return t
            t -= a
    return total


def _make_attn_kernel(*, masked, resident, tk, inv_sqrt_d, bf16_exp):
    def kernel(vlen_ref, q_ref, k_ref, v_ref, o_ref, qs_sc, m_sc, l_sc, acc_sc):
        b = pl.program_id(0)
        kv = pl.program_id(2)
        n_kv = pl.num_programs(2)

        @pl.when(kv == 0)
        def _init():
            m_sc[...] = jnp.full_like(m_sc, -jnp.inf)
            l_sc[...] = jnp.zeros_like(l_sc)
            acc_sc[...] = jnp.zeros_like(acc_sc)
            # Hoist the 1/sqrt(d) scale out of the K loop: scale Q once per Q
            # tile into VMEM scratch instead of once per kv step.
            q = q_ref[0]
            qs_sc[...] = q * jnp.asarray(inv_sqrt_d, dtype=q.dtype)

        def _tile():
            q = qs_sc[...]
            if resident:
                # Whole per-batch K/V is resident in VMEM; slice the tile.
                start = pl.multiple_of(kv * tk, tk)
                k = k_ref[0, pl.ds(start, tk), :]
                v = v_ref[0, pl.ds(start, tk), :]
            else:
                k = k_ref[0]
                v = v_ref[0]
            # q @ k^T without materializing a K transpose: contract on the last
            # dim of both operands, f32 accumulation on the MXU.
            s = lax.dot_general(q, k,
                                dimension_numbers=(((1,), (1,)), ((), ())),
                                preferred_element_type=jnp.float32)
            return s, v

        def _update(s, v):
            m_prev = m_sc[...]
            m_new = jnp.maximum(m_prev, jnp.max(s, axis=-1, keepdims=True))
            alpha = jnp.exp(m_prev - m_new)
            if bf16_exp:
                # bf16 EUP path (v6e/v7x): ~2x exp throughput; l/acc stay f32.
                p = jnp.exp((s - m_new).astype(jnp.bfloat16))
                psum = jnp.sum(p.astype(jnp.float32), axis=-1, keepdims=True)
            else:
                p = jnp.exp(s - m_new)
                psum = jnp.sum(p, axis=-1, keepdims=True)
            l_sc[...] = alpha * l_sc[...] + psum
            acc_sc[...] = alpha * acc_sc[...] + jnp.dot(
                p.astype(v.dtype), v, preferred_element_type=jnp.float32)
            m_sc[...] = m_new

        if masked:
            vlen = vlen_ref[b]
            k_start = kv * tk
            # Tiles entirely inside the valid range need no mask math at all.
            full_tile = k_start + tk <= vlen
            # Boundary tile, or the vlen==0 fallback (uniform distribution over
            # all K, matching the reference's -1e6 masking of every score).
            partial_tile = jnp.logical_and(
                jnp.logical_not(full_tile),
                jnp.logical_or(k_start < vlen, vlen == 0))

            @pl.when(full_tile)
            def _full():
                s, v = _tile()
                _update(s, v)

            @pl.when(partial_tile)
            def _partial():
                s, v = _tile()
                col = k_start + lax.broadcasted_iota(jnp.int32, s.shape, 1)
                s = jnp.where(col < vlen, s, jnp.float32(-1e6))
                _update(s, v)
        else:
            s, v = _tile()
            _update(s, v)

        # TODO(synk): attention-weight dropout is identity in eval mode; training
        # dropout (pltpu.prng_random_bits based) is not implemented here.

        @pl.when(kv == n_kv - 1)
        def _finalize():
            # EUP approximate reciprocal + one Newton-Raphson step.
            l = l_sc[...]
            inv_l = pl.reciprocal(l, approx=True)
            inv_l = inv_l * (2.0 - l * inv_l)
            o_ref[0] = (acc_sc[...] * inv_l).astype(o_ref.dtype)

    return kernel


def dot_product_attention(query, key, value, valid_len=None, *,
                          tq_target=None, tk_target=None, kv_resident=None):
    """query (B,Q,D), key (B,K,D), value (B,K,Dv) -> (B,Q,Dv)."""
    B, Q, D = query.shape
    _, K, _ = key.shape
    Dv = value.shape[-1]
    itemsize = jnp.dtype(query.dtype).itemsize

    info = _tpu_info()
    vmem_cap = info["vmem_cap"]

    masked = valid_len is not None
    if masked:
        valid_len = valid_len.astype(jnp.int32)
    else:
        valid_len = jnp.full((B,), K, dtype=jnp.int32)   # dummy, never read
    # TODO(synk): 2-D valid_len (per-query lengths) is not supported.

    # --- Tile selection ------------------------------------------------------
    # dtype-aware sublane alignment: 8 (f32), 16 (bf16), 32 (int8/fp8).
    sub_align = 8 * max(1, 4 // itemsize)
    if tq_target is None:
        # Flops-per-streamed-K/V-byte ridge: v6e needs tq ~640+, v7x ~320+;
        # v5e is the most HBM-starved so go big / prefer resident K/V.
        tq_target = 512 if info["is_v7"] else (768 if info["is_v6"] else 512)
    if tk_target is None:
        tk_target = 256 if info["is_v7"] else 512

    mxu_aligns = (256, 128) if (info["is_v6"] or info["is_v7"]) else (128,)
    aligns = tuple(a for a in mxu_aligns if a >= sub_align) + (sub_align,)

    tq = _pick_tile(Q, tq_target, aligns)
    tk = _pick_tile(K, tk_target, aligns)

    # v7x megacore: keep the parallel extent >= 2 so both TensorCores get work.
    if info["two_tc"] and B * (Q // tq) < 2:
        smaller = _pick_tile(Q, max(sub_align, tq // 2), aligns)
        if Q // smaller >= 2:
            tq = smaller

    n_q_tiles = Q // tq
    n_k_tiles = K // tk

    # --- Resident-K/V decision ----------------------------------------------
    # If per-batch K/V fits comfortably in VMEM (counting the pipeline's double
    # buffers), DMA it once per batch element instead of once per Q tile: HBM
    # K/V traffic drops by a factor of Q // tq.
    resident_need = 2 * K * (D + Dv) * itemsize
    if kv_resident is None:
        kv_resident = resident_need <= 0.4 * vmem_cap

    # --- BlockSpecs ----------------------------------------------------------
    def q_map(b, qi, kv, vlen_ref):
        return (b, qi, 0)

    def o_map(b, qi, kv, vlen_ref):
        return (b, qi, 0)

    if kv_resident:
        def kv_map(b, qi, kv, vlen_ref):
            return (b, 0, 0)
        k_spec = pl.BlockSpec((1, K, D), kv_map)
        v_spec = pl.BlockSpec((1, K, Dv), kv_map)
    else:
        if masked:
            def kv_map(b, qi, kv, vlen_ref):
                # Clamp fully-masked K tiles to the last useful tile so their
                # HBM DMAs are elided (block index unchanged => copy skipped);
                # their compute is skipped in-kernel.  valid_len == 0 must still
                # see every tile (uniform-distribution fallback).
                last = jnp.maximum((vlen_ref[b] + tk - 1) // tk - 1, 0)
                idx = jnp.where(vlen_ref[b] == 0, kv, jnp.minimum(kv, last))
                return (b, idx, 0)
        else:
            def kv_map(b, qi, kv, vlen_ref):
                return (b, kv, 0)
        k_spec = pl.BlockSpec((1, tk, D), kv_map)
        v_spec = pl.BlockSpec((1, tk, Dv), kv_map)

    grid_spec = pltpu.PrefetchScalarGridSpec(
        num_scalar_prefetch=1,                 # valid_len lives in SMEM
        grid=(B, n_q_tiles, n_k_tiles),        # reduction (K) axis last
        in_specs=[
            pl.BlockSpec((1, tq, D), q_map),
            k_spec,
            v_spec,
        ],
        out_specs=pl.BlockSpec((1, tq, Dv), o_map),
        scratch_shapes=[
            pltpu.VMEM((tq, D), query.dtype),    # pre-scaled Q tile
            pltpu.VMEM((tq, 1), jnp.float32),    # running max
            pltpu.VMEM((tq, 1), jnp.float32),    # running denominator
            pltpu.VMEM((tq, Dv), jnp.float32),   # f32 output accumulator
        ],
    )

    # --- VMEM budget (generation-aware) --------------------------------------
    if kv_resident:
        in_bytes = 2 * tq * D * itemsize + resident_need
    else:
        in_bytes = 2 * (tq * D + tk * (D + Dv)) * itemsize
    out_bytes = 2 * tq * Dv * itemsize
    scratch_bytes = tq * D * itemsize + (tq * Dv + 2 * tq) * 4
    temp_bytes = 4 * tq * tk * 4                # s / p / mask f32 temporaries
    need = in_bytes + out_bytes + scratch_bytes + temp_bytes
    vmem_limit = int(min(0.75 * vmem_cap, max(32 * 2 ** 20, 2 * need)))

    bf16_exp = info["bf16_eup"] and jnp.dtype(query.dtype) == jnp.bfloat16

    kernel = _make_attn_kernel(masked=masked, resident=kv_resident, tk=tk,
                               inv_sqrt_d=1.0 / math.sqrt(D), bf16_exp=bf16_exp)

    kv_passes = 1 if kv_resident else n_q_tiles
    cost = pl.CostEstimate(
        flops=2 * B * Q * K * (D + Dv),
        transcendentals=B * Q * K,
        bytes_accessed=int((query.size + B * Q * Dv) * itemsize
                           + (key.size + value.size) * itemsize * kv_passes),
    )

    # TODO(synk): for small per-head Dv (< 128) the output stores are partially
    # masked (vst.msk); folding heads into the lane dim is a wrapper-level
    # restructuring not done here.

    return pl.pallas_call(
        kernel,
        out_shape=jax.ShapeDtypeStruct((B, Q, Dv), query.dtype),
        grid_spec=grid_spec,
        compiler_params=pltpu.CompilerParams(
            dimension_semantics=("parallel", "parallel", "arbitrary"),
            vmem_limit_bytes=vmem_limit),
        cost_estimate=cost,
    )(valid_len, query, key, value)


def _reference(query, key, value, valid_len):
    d = query.shape[-1]
    scores = jnp.einsum("bqd,bkd->bqk", query, key) / math.sqrt(d)
    if valid_len is not None:
        col = jnp.arange(key.shape[1])[None, None, :]
        scores = jnp.where(col < valid_len[:, None, None], scores, -1e6)
    w = jax.nn.softmax(scores, axis=-1)
    return jnp.einsum("bqk,bkv->bqv", w, value)


if __name__ == "__main__":
    key0 = jax.random.PRNGKey(0)
    kq, kk, kv_ = jax.random.split(key0, 3)

    # Case 1: module-scale shapes, masked, auto (resident K/V) path.
    B, Q, K, D, Dv = 2, 8, 8, 32, 32
    query = jax.random.normal(kq, (B, Q, D), dtype=jnp.float32)
    key_ = jax.random.normal(kk, (B, K, D), dtype=jnp.float32)
    value = jax.random.normal(kv_, (B, K, Dv), dtype=jnp.float32)
    valid_len = jnp.array([5, 8], dtype=jnp.int32)

    out = jax.block_until_ready(dot_product_attention(query, key_, value, valid_len))
    ref = _reference(query, key_, value, valid_len)
    assert out.shape == (B, Q, Dv)
    assert jnp.allclose(out, ref, atol=1e-4, rtol=1e-4), "mismatch vs reference (case 1)"

    # Case 2: multiple Q/K tiles, streaming K/V path (masked-tile DMA elision,
    # full vs boundary-tile mask branches, online-softmax accumulation).
    B2, Q2, K2 = 2, 16, 24
    q2 = jax.random.normal(jax.random.PRNGKey(1), (B2, Q2, D), dtype=jnp.float32)
    k2 = jax.random.normal(jax.random.PRNGKey(2), (B2, K2, D), dtype=jnp.float32)
    v2 = jax.random.normal(jax.random.PRNGKey(3), (B2, K2, Dv), dtype=jnp.float32)
    vl2 = jnp.array([10, 24], dtype=jnp.int32)
    out2 = jax.block_until_ready(dot_product_attention(
        q2, k2, v2, vl2, tq_target=8, tk_target=8, kv_resident=False))
    ref2 = _reference(q2, k2, v2, vl2)
    assert jnp.allclose(out2, ref2, atol=1e-4, rtol=1e-4), "mismatch vs reference (case 2)"

    # Case 3: same shapes, resident K/V path with in-kernel pl.ds K slicing.
    out3 = jax.block_until_ready(dot_product_attention(
        q2, k2, v2, vl2, tq_target=8, tk_target=8, kv_resident=True))
    assert jnp.allclose(out3, ref2, atol=1e-4, rtol=1e-4), "mismatch vs reference (case 3)"

    # Case 4: no mask (Python-level specialization without any vlen logic).
    out4 = jax.block_until_ready(dot_product_attention(query, key_, value, None))
    ref4 = _reference(query, key_, value, None)
    assert jnp.allclose(out4, ref4, atol=1e-4, rtol=1e-4), "mismatch vs reference (case 4)"

    # Case 5: valid_len == 0 degenerates to a uniform distribution (reference
    # masks every score with -1e6).
    vl5 = jnp.array([0, 13], dtype=jnp.int32)
    out5 = jax.block_until_ready(dot_product_attention(
        q2, k2, v2, vl5, tq_target=8, tk_target=8, kv_resident=False))
    ref5 = _reference(q2, k2, v2, vl5)
    assert jnp.allclose(out5, ref5, atol=1e-4, rtol=1e-4), "mismatch vs reference (case 5)"

    print("KERNEL_OK")
</pallas_src>

<mosaic_0001>
module attributes {stable_mosaic.version = 11 : i64} {
  func.func @kernel(%arg0: i32, %arg1: i32, %arg2: i32, %arg3: memref<2xi32, #tpu.memory_space<smem>>, %arg4: memref<1x8x32xf32, #tpu.memory_space<vmem>>, %arg5: memref<1x8x32xf32, #tpu.memory_space<vmem>>, %arg6: memref<1x8x32xf32, #tpu.memory_space<vmem>>, %arg7: memref<1x8x32xf32, #tpu.memory_space<vmem>>, %arg8: memref<8x32xf32, #tpu.memory_space<vmem>>, %arg9: memref<8x1xf32, #tpu.memory_space<vmem>>, %arg10: memref<8x1xf32, #tpu.memory_space<vmem>>, %arg11: memref<8x32xf32, #tpu.memory_space<vmem>>) attributes {dimension_semantics = [#tpu.dimension_semantics<parallel>, #tpu.dimension_semantics<parallel>, #tpu.dimension_semantics<arbitrary>], iteration_bounds = array<i64: 2, 1, 1>, scalar_prefetch = 1 : i64, scratch_operands = 4 : i64, tpu.core_type = #tpu.core_type<tc>, window_params = [{transform_indices = @transform_0, window_bounds = array<i64: 1, 8, 32>}, {transform_indices = @transform_1, window_bounds = array<i64: 1, 8, 32>}, {transform_indices = @transform_2, window_bounds = array<i64: 1, 8, 32>}, {transform_indices = @transform_3, window_bounds = array<i64: 1, 8, 32>}]} {
    %c0_i32 = arith.constant 0 : i32
    %0 = arith.cmpi eq, %arg2, %c0_i32 : i32
    %1 = arith.extui %0 : i1 to i32
    %c0_i32_0 = arith.constant 0 : i32
    %2 = arith.cmpi ne, %1, %c0_i32_0 : i32
    scf.if %2 {
      %cst = arith.constant 0xFF800000 : f32
      %20 = vector.broadcast %cst : f32 to vector<8x1xf32>
      %c0 = arith.constant 0 : index
      %c0_7 = arith.constant 0 : index
      %21 = vector.load %arg9[%c0, %c0_7] : memref<8x1xf32, #tpu.memory_space<vmem>>, vector<8x1xf32>
      tpu.vector_store %arg9[%c0, %c0_7], %20 {strides = array<i32>} : memref<8x1xf32, #tpu.memory_space<vmem>>, vector<8x1xf32>,
      %cst_8 = arith.constant 0.000000e+00 : f32
      %22 = vector.broadcast %cst_8 : f32 to vector<8x1xf32>
      %c0_9 = arith.constant 0 : index
      %c0_10 = arith.constant 0 : index
      %23 = vector.load %arg10[%c0_9, %c0_10] : memref<8x1xf32, #tpu.memory_space<vmem>>, vector<8x1xf32>
      tpu.vector_store %arg10[%c0_9, %c0_10], %22 {strides = array<i32>} : memref<8x1xf32, #tpu.memory_space<vmem>>, vector<8x1xf32>,
      %cst_11 = arith.constant 0.000000e+00 : f32
      %24 = vector.broadcast %cst_11 : f32 to vector<8x32xf32>
      %c0_12 = arith.constant 0 : index
      %c0_13 = arith.constant 0 : index
      %25 = vector.load %arg11[%c0_12, %c0_13] : memref<8x32xf32, #tpu.memory_space<vmem>>, vector<8x32xf32>
      tpu.vector_store %arg11[%c0_12, %c0_13], %24 {strides = array<i32>} : memref<8x32xf32, #tpu.memory_space<vmem>>, vector<8x32xf32>,
      %c0_14 = arith.constant 0 : index
      %c0_15 = arith.constant 0 : index
      %c0_16 = arith.constant 0 : index
      %26 = vector.load %arg4[%c0_14, %c0_15, %c0_16] : memref<1x8x32xf32, #tpu.memory_space<vmem>>, vector<1x8x32xf32>
      %27 = vector.shape_cast %26 : vector<1x8x32xf32> to vector<8x32xf32>
      %cst_17 = arith.constant 0.176776692 : f32
      %28 = vector.broadcast %cst_17 : f32 to vector<8x32xf32>
      %29 = arith.mulf %27, %28 : vector<8x32xf32>
      %c0_18 = arith.constant 0 : index
      %c0_19 = arith.constant 0 : index
      %30 = vector.load %arg8[%c0_18, %c0_19] : memref<8x32xf32, #tpu.memory_space<vmem>>, vector<8x32xf32>
      tpu.vector_store %arg8[%c0_18, %c0_19], %29 {strides = array<i32>} : memref<8x32xf32, #tpu.memory_space<vmem>>, vector<8x32xf32>,
    } else {
    }
    %3 = arith.index_cast %arg0 : i32 to index
    %4 = memref.load %arg3[%3] : memref<2xi32, #tpu.memory_space<smem>>
    %c8_i32 = arith.constant 8 : i32
    %5 = arith.muli %arg2, %c8_i32 : i32
    %c8_i32_1 = arith.constant 8 : i32
    %6 = arith.addi %5, %c8_i32_1 : i32
    %7 = arith.cmpi sle, %6, %4 : i32
    %true = arith.constant true
    %8 = arith.xori %7, %true : i1
    %9 = arith.cmpi slt, %5, %4 : i32
    %c0_i32_2 = arith.constant 0 : i32
    %10 = arith.cmpi eq, %4, %c0_i32_2 : i32
    %11 = arith.ori %9, %10 : i1
    %12 = arith.andi %8, %11 : i1
    %13 = arith.extui %7 : i1 to i32
    %c0_i32_3 = arith.constant 0 : i32
    %14 = arith.cmpi ne, %13, %c0_i32_3 : i32
    scf.if %14 {
      %c0 = arith.constant 0 : index
      %c0_7 = arith.constant 0 : index
      %20 = vector.load %arg8[%c0, %c0_7] : memref<8x32xf32, #tpu.memory_space<vmem>>, vector<8x32xf32>
      %c8_i32_8 = arith.constant 8 : i32
      %21 = arith.muli %arg2, %c8_i32_8 : i32
      %22 = tpu.assume_multiple %21, 8 : i32
      %c0_9 = arith.constant 0 : index
      %23 = arith.index_cast %22 : i32 to index
      %c0_10 = arith.constant 0 : index
      %24 = vector.load %arg5[%c0_9, %23, %c0_10] : memref<1x8x32xf32, #tpu.memory_space<vmem>>, vector<1x8x32xf32>
      %25 = vector.shape_cast %24 : vector<1x8x32xf32> to vector<8x32xf32>
      %c0_11 = arith.constant 0 : index
      %26 = arith.index_cast %22 : i32 to index
      %c0_12 = arith.constant 0 : index
      %27 = vector.load %arg6[%c0_11, %26, %c0_12] : memref<1x8x32xf32, #tpu.memory_space<vmem>>, vector<1x8x32xf32>
      %28 = vector.shape_cast %27 : vector<1x8x32xf32> to vector<8x32xf32>
      %cst = arith.constant dense<0.000000e+00> : vector<8x8xf32>
      %29 = tpu.matmul %20, %25, %cst {dimension_numbers = #tpu.dot_dimension_numbers<[1], [1], [0], [0], [0, 0, 1, 0], [], []>} : vector<8x32xf32>, vector<8x32xf32>, vector<8x8xf32> -> vector<8x8xf32>
      %c0_13 = arith.constant 0 : index
      %c0_14 = arith.constant 0 : index
      %30 = vector.load %arg9[%c0_13, %c0_14] : memref<8x1xf32, #tpu.memory_space<vmem>>, vector<8x1xf32>
      %cst_15 = arith.constant dense<0xFF800000> : vector<8xf32>
      %31 = vector.multi_reduction <maximumf>, %29, %cst_15 [1] : vector<8x8xf32> to vector<8xf32>
      %32 = vector.shape_cast %31 : vector<8xf32> to vector<8x1xf32>
      %33 = arith.maximumf %30, %32 : vector<8x1xf32>
      %34 = arith.subf %30, %33 : vector<8x1xf32>
      %35 = math.exp %34 : vector<8x1xf32>
      %36 = vector.broadcast %33 : vector<8x1xf32> to vector<8x8xf32>
      %37 = arith.subf %29, %36 : vector<8x8xf32>
      %38 = math.exp %37 : vector<8x8xf32>
      %cst_16 = arith.constant dense<0.000000e+00> : vector<8xf32>
      %39 = vector.multi_reduction <add>, %38, %cst_16 [1] : vector<8x8xf32> to vector<8xf32>
      %40 = vector.shape_cast %39 : vector<8xf32> to vector<8x1xf32>
      %c0_17 = arith.constant 0 : index
      %c0_18 = arith.constant 0 : index
      %41 = vector.load %arg10[%c0_17, %c0_18] : memref<8x1xf32, #tpu.memory_space<vmem>>, vector<8x1xf32>
      %42 = arith.mulf %35, %41 : vector<8x1xf32>
      %43 = arith.addf %42, %40 : vector<8x1xf32>
      %c0_19 = arith.constant 0 : index
      %c0_20 = arith.constant 0 : index
      %44 = vector.load %arg10[%c0_19, %c0_20] : memref<8x1xf32, #tpu.memory_space<vmem>>, vector<8x1xf32>
      tpu.vector_store %arg10[%c0_19, %c0_20], %43 {strides = array<i32>} : memref<8x1xf32, #tpu.memory_space<vmem>>, vector<8x1xf32>,
      %c0_21 = arith.constant 0 : index
      %c0_22 = arith.constant 0 : index
      %45 = vector.load %arg11[%c0_21, %c0_22] : memref<8x32xf32, #tpu.memory_space<vmem>>, vector<8x32xf32>
      %46 = vector.broadcast %35 : vector<8x1xf32> to vector<8x32xf32>
      %47 = arith.mulf %46, %45 : vector<8x32xf32>
      %cst_23 = arith.constant dense<0.000000e+00> : vector<8x32xf32>
      %48 = tpu.matmul %38, %28, %cst_23 {dimension_numbers = #tpu.dot_dimension_numbers<[1], [0], [0], [1], [0, 0, 1, 1], [], []>} : vector<8x8xf32>, vector<8x32xf32>, vector<8x32xf32> -> vector<8x32xf32>
      %49 = arith.addf %47, %48 : vector<8x32xf32>
      %c0_24 = arith.constant 0 : index
      %c0_25 = arith.constant 0 : index
      %50 = vector.load %arg11[%c0_24, %c0_25] : memref<8x32xf32, #tpu.memory_space<vmem>>, vector<8x32xf32>
      tpu.vector_store %arg11[%c0_24, %c0_25], %49 {strides = array<i32>} : memref<8x32xf32, #tpu.memory_space<vmem>>, vector<8x32xf32>,
      %c0_26 = arith.constant 0 : index
      %c0_27 = arith.constant 0 : index
      %51 = vector.load %arg9[%c0_26, %c0_27] : memref<8x1xf32, #tpu.memory_space<vmem>>, vector<8x1xf32>
      tpu.vector_store %arg9[%c0_26, %c0_27], %33 {strides = array<i32>} : memref<8x1xf32, #tpu.memory_space<vmem>>, vector<8x1xf32>,
    } else {
    }
    %15 = arith.extui %12 : i1 to i32
    %c0_i32_4 = arith.constant 0 : i32
    %16 = arith.cmpi ne, %15, %c0_i32_4 : i32
    scf.if %16 {
      %c0 = arith.constant 0 : index
      %c0_7 = arith.constant 0 : index
      %20 = vector.load %arg8[%c0, %c0_7] : memref<8x32xf32, #tpu.memory_space<vmem>>, vector<8x32xf32>
      %c8_i32_8 = arith.constant 8 : i32
      %21 = arith.muli %arg2, %c8_i32_8 : i32
      %22 = tpu.assume_multiple %21, 8 : i32
      %c0_9 = arith.constant 0 : index
      %23 = arith.index_cast %22 : i32 to index
      %c0_10 = arith.constant 0 : index
      %24 = vector.load %arg5[%c0_9, %23, %c0_10] : memref<1x8x32xf32, #tpu.memory_space<vmem>>, vector<1x8x32xf32>
      %25 = vector.shape_cast %24 : vector<1x8x32xf32> to vector<8x32xf32>
      %c0_11 = arith.constant 0 : index
      %26 = arith.index_cast %22 : i32 to index
      %c0_12 = arith.constant 0 : index
      %27 = vector.load %arg6[%c0_11, %26, %c0_12] : memref<1x8x32xf32, #tpu.memory_space<vmem>>, vector<1x8x32xf32>
      %28 = vector.shape_cast %27 : vector<1x8x32xf32> to vector<8x32xf32>
      %cst = arith.constant dense<0.000000e+00> : vector<8x8xf32>
      %29 = tpu.matmul %20, %25, %cst {dimension_numbers = #tpu.dot_dimension_numbers<[1], [1], [0], [0], [0, 0, 1, 0], [], []>} : vector<8x32xf32>, vector<8x32xf32>, vector<8x8xf32> -> vector<8x8xf32>
      %30 = tpu.iota {dimensions = array<i32: 1>} : vector<8x8xi32>
      %31 = vector.broadcast %5 : i32 to vector<8x8xi32>
      %32 = arith.addi %31, %30 : vector<8x8xi32>
      %33 = vector.broadcast %4 : i32 to vector<8x8xi32>
      %34 = arith.cmpi slt, %32, %33 : vector<8x8xi32>
      %cst_13 = arith.constant -1.000000e+06 : f32
      %35 = vector.broadcast %cst_13 : f32 to vector<8x8xf32>
      %36 = arith.select %34, %29, %35 : vector<8x8xi1>, vector<8x8xf32>
      %c0_14 = arith.constant 0 : index
      %c0_15 = arith.constant 0 : index
      %37 = vector.load %arg9[%c0_14, %c0_15] : memref<8x1xf32, #tpu.memory_space<vmem>>, vector<8x1xf32>
      %cst_16 = arith.constant dense<0xFF800000> : vector<8xf32>
      %38 = vector.multi_reduction <maximumf>, %36, %cst_16 [1] : vector<8x8xf32> to vector<8xf32>
      %39 = vector.shape_cast %38 : vector<8xf32> to vector<8x1xf32>
      %40 = arith.maximumf %37, %39 : vector<8x1xf32>
      %41 = arith.subf %37, %40 : vector<8x1xf32>
      %42 = math.exp %41 : vector<8x1xf32>
      %43 = vector.broadcast %40 : vector<8x1xf32> to vector<8x8xf32>
      %44 = arith.subf %36, %43 : vector<8x8xf32>
      %45 = math.exp %44 : vector<8x8xf32>
      %cst_17 = arith.constant dense<0.000000e+00> : vector<8xf32>
      %46 = vector.multi_reduction <add>, %45, %cst_17 [1] : vector<8x8xf32> to vector<8xf32>
      %47 = vector.shape_cast %46 : vector<8xf32> to vector<8x1xf32>
      %c0_18 = arith.constant 0 : index
      %c0_19 = arith.constant 0 : index
      %48 = vector.load %arg10[%c0_18, %c0_19] : memref<8x1xf32, #tpu.memory_space<vmem>>, vector<8x1xf32>
      %49 = arith.mulf %42, %48 : vector<8x1xf32>
      %50 = arith.addf %49, %47 : vector<8x1xf32>
      %c0_20 = arith.constant 0 : index
      %c0_21 = arith.constant 0 : index
      %51 = vector.load %arg10[%c0_20, %c0_21] : memref<8x1xf32, #tpu.memory_space<vmem>>, vector<8x1xf32>
      tpu.vector_store %arg10[%c0_20, %c0_21], %50 {strides = array<i32>} : memref<8x1xf32, #tpu.memory_space<vmem>>, vector<8x1xf32>,
      %c0_22 = arith.constant 0 : index
      %c0_23 = arith.constant 0 : index
      %52 = vector.load %arg11[%c0_22, %c0_23] : memref<8x32xf32, #tpu.memory_space<vmem>>, vector<8x32xf32>
      %53 = vector.broadcast %42 : vector<8x1xf32> to vector<8x32xf32>
      %54 = arith.mulf %53, %52 : vector<8x32xf32>
      %cst_24 = arith.constant dense<0.000000e+00> : vector<8x32xf32>
      %55 = tpu.matmul %45, %28, %cst_24 {dimension_numbers = #tpu.dot_dimension_numbers<[1], [0], [0], [1], [0, 0, 1, 1], [], []>} : vector<8x8xf32>, vector<8x32xf32>, vector<8x32xf32> -> vector<8x32xf32>
      %56 = arith.addf %54, %55 : vector<8x32xf32>
      %c0_25 = arith.constant 0 : index
      %c0_26 = arith.constant 0 : index
      %57 = vector.load %arg11[%c0_25, %c0_26] : memref<8x32xf32, #tpu.memory_space<vmem>>, vector<8x32xf32>
      tpu.vector_store %arg11[%c0_25, %c0_26], %56 {strides = array<i32>} : memref<8x32xf32, #tpu.memory_space<vmem>>, vector<8x32xf32>,
      %c0_27 = arith.constant 0 : index
      %c0_28 = arith.constant 0 : index
      %58 = vector.load %arg9[%c0_27, %c0_28] : memref<8x1xf32, #tpu.memory_space<vmem>>, vector<8x1xf32>
      tpu.vector_store %arg9[%c0_27, %c0_28], %40 {strides = array<i32>} : memref<8x1xf32, #tpu.memory_space<vmem>>, vector<8x1xf32>,
    } else {
    }
    %c0_i32_5 = arith.constant 0 : i32
    %17 = arith.cmpi eq, %arg2, %c0_i32_5 : i32
    %18 = arith.extui %17 : i1 to i32
    %c0_i32_6 = arith.constant 0 : i32
    %19 = arith.cmpi ne, %18, %c0_i32_6 : i32
    scf.if %19 {
      %c0 = arith.constant 0 : index
      %c0_7 = arith.constant 0 : index
      %20 = vector.load %arg10[%c0, %c0_7] : memref<8x1xf32, #tpu.memory_space<vmem>>, vector<8x1xf32>
      %21 = tpu.reciprocal %20 {approx = true} : vector<8x1xf32> -> vector<8x1xf32>
      %22 = arith.mulf %20, %21 : vector<8x1xf32>
      %cst = arith.constant 2.000000e+00 : f32
      %23 = vector.broadcast %cst : f32 to vector<8x1xf32>
      %24 = arith.subf %23, %22 : vector<8x1xf32>
      %25 = arith.mulf %21, %24 : vector<8x1xf32>
      %c0_8 = arith.constant 0 : index
      %c0_9 = arith.constant 0 : index
      %26 = vector.load %arg11[%c0_8, %c0_9] : memref<8x32xf32, #tpu.memory_space<vmem>>, vector<8x32xf32>
      %27 = vector.broadcast %25 : vector<8x1xf32> to vector<8x32xf32>
      %28 = arith.mulf %26, %27 : vector<8x32xf32>
      %c0_10 = arith.constant 0 : index
      %c0_11 = arith.constant 0 : index
      %c0_12 = arith.constant 0 : index
      %29 = vector.load %arg7[%c0_10, %c0_11, %c0_12] : memref<1x8x32xf32, #tpu.memory_space<vmem>>, vector<1x8x32xf32>
      %30 = vector.shape_cast %29 : vector<1x8x32xf32> to vector<8x32xf32>
      %31 = vector.shape_cast %28 : vector<8x32xf32> to vector<1x8x32xf32>
      tpu.vector_store %arg7[%c0_10, %c0_11, %c0_12], %31 {strides = array<i32>} : memref<1x8x32xf32, #tpu.memory_space<vmem>>, vector<1x8x32xf32>,
    } else {
    }
    return
  }
  func.func @transform_0(%arg0: i32, %arg1: i32, %arg2: i32, %arg3: memref<2xi32, #tpu.memory_space<smem>>) -> (i32, i32, i32) {
    %c0_i32 = arith.constant 0 : i32
    %c0_i32_0 = arith.constant 0 : i32
    return %arg0, %arg1, %c0_i32 : i32, i32, i32
  }
  func.func @transform_1(%arg0: i32, %arg1: i32, %arg2: i32, %arg3: memref<2xi32, #tpu.memory_space<smem>>) -> (i32, i32, i32) {
    %c0_i32 = arith.constant 0 : i32
    %c0_i32_0 = arith.constant 0 : i32
    %c0_i32_1 = arith.constant 0 : i32
    return %arg0, %c0_i32, %c0_i32_0 : i32, i32, i32
  }
  func.func @transform_2(%arg0: i32, %arg1: i32, %arg2: i32, %arg3: memref<2xi32, #tpu.memory_space<smem>>) -> (i32, i32, i32) {
    %c0_i32 = arith.constant 0 : i32
    %c0_i32_0 = arith.constant 0 : i32
    %c0_i32_1 = arith.constant 0 : i32
    return %arg0, %c0_i32, %c0_i32_0 : i32, i32, i32
  }
  func.func @transform_3(%arg0: i32, %arg1: i32, %arg2: i32, %arg3: memref<2xi32, #tpu.memory_space<smem>>) -> (i32, i32, i32) {
    %c0_i32 = arith.constant 0 : i32
    %c0_i32_0 = arith.constant 0 : i32
    return %arg0, %arg1, %c0_i32 : i32, i32, i32
  }
}

</mosaic_0001>

<bundles_post_ra>
// kernel: tpu_custom_call.1
= control target key start
LH: loop header
LB: loop body
LE: loop exit
PB: predicated region body
PF: predicated region fallthrough
CT: control target
= control target key end

     0   :  { %s1200_s15 = smov [#allocation7]   ;;  %s1486_s0 = inlined_call_operand.hbm [shape: s32[2], index: 0, kind: input, shape index: {}]   ;;  %s1487_s1 = inlined_call_operand.hbm [shape: f32[2,8,32], index: 1, kind: input, shape index: {}]   ;;  %s1488_s2 = inlined_call_operand.hbm [shape: f32[2,8,32], index: 2, kind: input, shape index: {}]   ;;  %s1489_s3 = inlined_call_operand.hbm [shape: f32[2,8,32], index: 3, kind: input, shape index: {}]   ;;  %s1490_s4 = inlined_call_operand.hbm [shape: f32[2,8,32], index: 4, kind: output, shape index: {}]  }
   0x1   :  { %1494 = sst [smem:[#allocation21_spill]] %s1488_s2 }
   0x2   :  { %10 = dma.hbm_to_smem %s1486_s0, 16, %s1200_s15, [#allocation6] }
   0x3   :  { %1162 = dma.done.wait [#allocation6], 16 }
   0x4   :  { %1163 = vsyncadd [#allocation6], 4294967280 }
   0x5   :  { %12 = sfence }
   0x6   :  { %13 = vsyncpa [#allocation9], 0 }
   0x7   :  { %15 = vsyncpa [#allocation9 + $0x1], 0 }
   0x8   :  { %16 = vsyncpa [#allocation12], 0 }
   0x9   :  { %18 = vsyncpa [#allocation12 + $0x1], 0 }
   0xa   :  { %19 = vsyncpa [#allocation10], 0 }
   0xb   :  { %21 = vsyncpa [#allocation10 + $0x1], 0  ;;  %s1242_s18 = smov 0   ;;  %s1244_s19 = smov 0  }
   0xc   :  { %s1246_s20 = smov 0   ;;  %s1248_s21 = smov 0  }
   0xd   :  { %s1250_s22 = smov 0   ;;  %s1252_s0 = smov 0  }
   0xe LB: > { %1495 = sst [smem:[#allocation19_spill]] %s1194_s22  ;;  %s1273_s23 = sadd.s32 4294967295, %s1198_s0   ;;  %s1198_s0 = sphi %s1252_s0, %s27_s0   ;;  %s1194_s22 = sphi %s1250_s22, %s1508_s22   ;;  %s1190_s21 = sphi %s1248_s21, %s1507_s21   ;;  %s1186_s20 = sphi %s1246_s20, %s1511_s20   ;;  %s1182_s19 = sphi %s1244_s19, %s1510_s19   ;;  %s1178_s18 = sphi %s1242_s18, %s1509_s18  }
   0xf   : > { %s867_s24 = sadd.s32 4294967294, %s1198_s0   ;;  %s46_s25 = sadd.s32 1, %s1194_s22 }
  0x10   : > { %s55_s26 = sadd.s32 1, %s1186_s20  ;;  %p48_p0 = scmp.ge.s32.totalorder %s46_s25, 2 }
  0x11   : > { %p62_p1 = scmp.ne.s32.totalorder %s1186_s20, %s1182_s19  ;;  %p63_p2 = scmp.eq.s32.totalorder %s1198_s0, 0 }
  0x12   : > { %p68_p3 = scmp.ne.s32.totalorder %s1182_s19, %s1178_s18  ;;  %s1513_s25 = smov (%p48_p0, %s46_s25), 0 }
  0x13   : > { %1496 = sst [smem:[#allocation20_spill]] %s1513_s25  ;;  %p1285_p4 = por %p63_p2, %p62_p1 }
  0x14   : > { %p69_p5 = scmp.eq.s32.totalorder %s1273_s23, 0  ;;  %s50_s28 = ssub.s32 %s1194_s22, %s1513_s25 }
  0x15   : > { %p146_p6 = scmp.eq.s32.totalorder %s1273_s23, 1  ;;  %p53_p7 = scmp.eq.s32.totalorder %s50_s28, 0 }
  0x16   : > { %p1293_p8 = por %p69_p5, %p68_p3  ;;  %p152_p10 = scmp.eq.s32.totalorder %s867_s24, 1 }
  0x17   : > { %p1297_p9 = por %p146_p6, %p62_p1  ;;  %p945_p13 = scmp.lt.s32.totalorder %s1198_s0, 2 }
  0x18   : > { %s1302_s5 = scalar_select %p53_p7, %s1186_s20, %s55_s26  }
  0x19   : > { %p1304_p11 = por %p152_p10, %p68_p3  ;;  %s1491_s7 = sand.u32 1, %s1186_s20  }
  0x1a   : > { %s1313_s8 = sshll.u32 %s1491_s7, 3  ;;  %s1316_s9 = sshll.u32 %s1194_s22, 7 }
  0x1b   : > { %p1320_p0 = pnand %p945_p13, %p1285_p4  ;;  %s191_s11 = sand.u32 1, %s1198_s0  }
  0x1c   : > { %s1502_s2 = sld [smem:[#allocation21_spill]]  ;;  %s195_s15 = scalar_lea.vmem [#allocation11], %s1313_s8 }
  0x1d   : > { %s202_s16 = sshll.u32 %s195_s15, 4  ;;  %p876_p1 = scmp.ge.s32.totalorder %s1198_s0, 1  ;;  %s203_s16 = int_to_ptr.vmem [resolvable:$true] %s202_s16 }
  0x1e   : > { %p225_p2 = scmp.lt.s32.totalorder %s1198_s0, 3  ;;  %s1332_s17 = scalar_lea.sflag [#allocation12], %s191_s11 }
  0x1f   : > { %p1030_p3 = pneg %p1320_p0  ;;  %s1041_s24 = scalar_lea.vmem %s203_s16, 128 }
  0x20   : > { %p1042_p4 = scmp.ne.s32.totalorder %s203_s16, %s1041_s24  ;;  %s1201_s26 = smov [#allocation11]  }
  0x21   : > { %s1046_s27 = sshll.u32 %s1201_s26, 4  ;;  %s1047_s27 = int_to_ptr.vmem [resolvable:$false] %s1046_s27 }
  0x22   : > { %s200_s14 = scalar_lea.hbm %s1502_s2, %s1316_s9  ;;  %p1044_p5 = pnand %p1042_p4, %p1030_p3 }
  0x23   : > { %s1048_s28 = scalar_lea.vmem %s1047_s27, 256  ;;  %p1049_p7 = scmp.lt.s32.totalorder %s203_s16, %s1047_s27 }
  0x24   : > { %p1045_p6 = pneg %p1044_p5  ;;  %p1050_p10 = scmp.lt.s32.totalorder %s1048_s28, %s1041_s24 }
  0x26   : > { %p1051_p13 = por %p1050_p10, %p1049_p7 }
  0x28   : > { %p1052_p12 = pnand %p1051_p13, %p1045_p6 }
  0x2a   : > { %1055 = shalt.err (!%p1052_p12)
}
  0x2b   : > { %937 = dma.hbm_to_vmem [thread:$0]  (!%p1320_p0), %s200_s14, 128, %s203_s16, %s1332_s17  }
  0x2c   : > { %p1346_p4 = pnand %p876_p1, %p225_p2  ;;  %s182_s15 = scalar_lea.hbm %s1487_s1, %s1316_s9 }
  0x2d   : > { %s176_s24 = scalar_lea.vmem [#allocation8], %s1313_s8  ;;  %s218_s7 = scalar_lea.hbm %s1489_s3, %s1316_s9 }
  0x2e   : > { %s184_s26 = sshll.u32 %s176_s24, 4  ;;  %s1504_s2 = sand.u32 1, %s1186_s20   ;;  %s185_s26 = int_to_ptr.vmem [resolvable:$true] %s184_s26 }
  0x2f   : > { %s173_s25 = scalar_lea.sflag [#allocation9], %s1504_s2  ;;  %s1069_s14 = scalar_lea.vmem %s185_s26, 128 }
  0x30   : > { %p1070_p12 = scmp.ne.s32.totalorder %s185_s26, %s1069_s14  ;;  %s1202_s16 = smov [#allocation8]  }
  0x31   : > { %s1074_s22 = sshll.u32 %s1202_s16, 4  ;;  %s1075_s22 = int_to_ptr.vmem [resolvable:$false] %s1074_s22 }
  0x32   : > { %p1072_p1 = pnand %p1070_p12, %p1030_p3  ;;  %s1076_s12 = scalar_lea.vmem %s1075_s22, 256 }
  0x33   : > { %p1077_p5 = scmp.lt.s32.totalorder %s185_s26, %s1075_s22  ;;  %p1078_p6 = scmp.lt.s32.totalorder %s1076_s12, %s1069_s14 }
  0x34   : > { %p1073_p2 = pneg %p1072_p1 }
  0x35   : > { %p1079_p7 = por %p1078_p6, %p1077_p5 }
  0x37   : > { %p1080_p10 = pnand %p1079_p7, %p1073_p2 }
  0x39   : > { %1083 = shalt.err (!%p1080_p10)
}
  0x3a   : > { %934 = dma.hbm_to_vmem [thread:$0]  (!%p1320_p0), %s182_s15, 128, %s185_s26, %s173_s25  }
  0x3b   : > { %s213_s2 = scalar_lea.vmem [#allocation13], %s1313_s8  ;;  %s1203_s27 = smov [#allocation13]  }
  0x3c   : > { %s220_s13 = sshll.u32 %s213_s2, 4  ;;  %s1102_s22 = sshll.u32 %s1203_s27, 4  ;;  %s221_s13 = int_to_ptr.vmem [resolvable:$true] %s220_s13  ;;  %s1103_s22 = int_to_ptr.vmem [resolvable:$false] %s1102_s22 }
  0x3d   : > { %s1097_s24 = scalar_lea.vmem %s221_s13, 128  ;;  %s1104_s28 = scalar_lea.vmem %s1103_s22, 256 }
  0x3e   : > { %p1098_p13 = scmp.ne.s32.totalorder %s221_s13, %s1097_s24  ;;  %p1105_p2 = scmp.lt.s32.totalorder %s221_s13, %s1103_s22 }
  0x3f   : > { %p1106_p5 = scmp.lt.s32.totalorder %s1104_s28, %s1097_s24 }
  0x40   : > { %p1100_p12 = pnand %p1098_p13, %p1030_p3 }
  0x41   : > { %p1107_p6 = por %p1106_p5, %p1105_p2 }
  0x42   : > { %p1101_p1 = pneg %p1100_p12 }
  0x44   : > { %p1108_p7 = pnand %p1107_p6, %p1101_p1 }
  0x46   : > { %1111 = shalt.err (!%p1108_p7)
}
  0x47   : > { %940 = dma.hbm_to_vmem [thread:$0]  (!%p1320_p0), %s218_s7, 128, %s221_s13, %s1332_s17  }
  0x48   : > { %229 = sbr.rel (%p1346_p4) target bundleno = 1614 (0x64e), region = 32  ;;  %s1381_s15 = sand.u32 (!%p1346_p4), 1, %s1182_s19  }
  0x49   : > { %s1384_s26 = sshll.u32 (!%p1346_p4), %s1381_s15, 3  ;;  %s232_s10 = scalar_lea.sflag (!%p1346_p4), [#allocation9], %s1381_s15 }
  0x4a   : > { %s235_s14 = scalar_lea.vmem (!%p1346_p4), [#allocation8], %s1384_s26 }
  0x4d   : > { %1165 = dma.done.wait (%p1293_p8), %s232_s10, 128  }
  0x4e   : > { %1167 = vsyncadd (%p1293_p8), %s232_s10, 4294967168  ;;  %s240_s7 = sand.u32 1, %s1273_s23   ;;  %s244_s17 = scalar_lea.vmem [#allocation11], %s1384_s26 }
  0x4f   : > { %s241_s9 = scalar_lea.sflag [#allocation12], %s240_s7 }
  0x50   : > { %1169 = dma.done.wait (%p1293_p8), %s241_s9, 256  }
  0x51   : > { %1171 = vsyncadd (%p1293_p8), %s241_s9, 4294967040  ;;  %vm290_vm0 = vcmask 7168   ;;  %s1399_s11 = sld [smem:[#allocation7 + %s1190_s21]]  ;;  %v1204_v0 = vmov -inf   ;;  %v1205_v1 = vmov 0.0   ;;  %vm293_vm1 = vcmask 261120  }
  0x52   : > { %291 = vst.msk [vmem:[#allocation3] sm:$0xff] %vm290_vm0, %v1204_v0  ;;  %292 = vst.msk [vmem:[#allocation4] sm:$0xff] %vm290_vm0, %v1205_v1  ;;  %v295_v2 = vld [vmem:[%s235_s14] sm:$0xff]  ;;  %s253_s29 = scalar_lea.vmem [#allocation13], %s1384_s26  ;;  %s285_s16 = scalar_lea.vmem [#allocation14], %s1384_s26 }
  0x53   : > { %294 = vst.msk [vmem:[#allocation5] sm:$0xff] %vm293_vm1, %v1205_v1  ;;  %v296_v3 = vmul.f32 0.17677669, %v295_v2 }
  0x55   : > { %297 = vst.msk [vmem:[#allocation2] sm:$0xff] %vm293_vm1, %v296_v3 }
  0x57   : > { %p883_p0 = scmp.gt.s32.totalorder %s1399_s11, 0  ;;  %p882_p8 = scmp.lt.s32.totalorder %s1399_s11, 8 }
  0x58   : > { %p304_p3 = scmp.eq.s32.totalorder %s1399_s11, 0 }
  0x59   : > { %310 = sbr.rel (%p882_p8) target bundleno = 771 (0x303), region = 52 }
  0x5a   : > { %p305_p4 = por %p883_p0, %p304_p3 }
  0x5c   : > { %p1408_p10 = pnand %p882_p8, %p305_p4 }
  0x5e   : > { %v313_v4 = vld [vmem:[%s244_s17] sm:$0xff]  ;;  %v1206_v5 = vmov 0.0   ;;  %vm1207_vm2 = vmmov 0   ;;  %v311_v6 = vld [vmem:[#allocation2] sm:$0xff]  ;;  %vm394_vm3 = vcmask 64512   ;;  %v1208_v10 = vmov 0  }
  0x5f   : > { %903 = vmatprep.subr.mxu0 %v1206_v5  ;;  %905 = vmatprep.mubr.msk.f32.mxu0 %vm1207_vm2, %v1206_v5  ;;  %v393_v11 = vld [vmem:[#allocation3] sm:$0xff]  ;;  %v413_v23 = vld [vmem:[#allocation4] sm:$0xff]  ;;  %v418_v27 = vld [vmem:[#allocation5] sm:$0xff] }
  0x60   : > { %904 = vmatpush3.xpose.msk.msra.mxu0 %vm293_vm1, %v313_v4  ;;  %908 = vmatprep.subr.mxu1 %v1206_v5  ;;  %v315_v15 = vld [vmem:[%s253_s29] sm:$0xff] }
  0x61   : > { %910 = vmatprep.mubr.msk.f32.mxu1 %vm1207_vm2, %v1206_v5  ;;  %1005 = vset.pattern.permute.xlu0 %v1208_v10 }
  0x62   : > { %1006 = vset.pattern.permute.xlu1 %v1208_v10  ;;  %909 = vmatpush3.msra.mxu1 %v315_v15 }
  0x63   : > { %906 = vmatmul.mubr.msk.f32.vlgmr.msra.gmra.mxu0 %vm293_vm1, %v311_v6 }
 0x123   : > { %v389_v7 = vpop.f32.mrf.mxu0 }
 0x124   : > { %v395_v8 = vsel %vm394_vm3, %v389_v7, -inf }
 0x125   : > { %396 = vmax.xlane.f32.xlu0 %v395_v8  ;;  %v907_v9 = vpop.f32.mrf.mxu0 }
 0x1ae   : > { %v397_v12 = vpop.xlane.xlu0 %396 }
 0x1af   : > { %v398_v13 = vmax.f32 %v393_v11, %v397_v12 }
 0x1b1   : > { %v399_v14 = vsub.f32 %v393_v11, %v398_v13  ;;  %500 = vst.msk [vmem:[#allocation3] sm:$0xff] %vm290_vm0, %v398_v13  ;;  %404 = vperm.xlu0 %1005, %v398_v13  }
 0x1b3   : > { %v400_v20 = vmul.f32 1.442695, %v399_v14 }
 0x22c   : > { %v405_v16 = vpop.permute.xlu0 %404 }
 0x22d   : > { %v407_v17 = vsub.f32 %v389_v7, %v405_v16 }
 0x22f   : > { %v408_v18 = vmul.f32 1.442695, %v407_v17 }
 0x231   : > { %1007 = vpow2.f32 %v408_v18 }
 0x232   : > { %1009 = vpow2.f32 %v400_v20 }
 0x23e   : > { %v1008_v19 = vpop.eup %1007 }
 0x23f   : > { %911 = vmatmul.mubr.msk.f32.vlgmr.msra.gmra.mxu1 %vm394_vm3, %v1008_v19  ;;  %v410_v21 = vsel %vm394_vm3, %v1008_v19, 0.0  ;;  %v1010_v22 = vpop.eup %1009 }
 0x240   : > { %411 = vadd.xlane.f32.xlu1 %v410_v21  ;;  %v414_v24 = vmul.f32 %v1010_v22, %v413_v23 }
 0x251   : > { %421 = vperm.xlu1 %1006, %v1010_v22  }
 0x2c9   : > { %v412_v25 = vpop.xlane.xlu1 %411 }
 0x2ca   : > { %v415_v26 = vadd.f32 %v414_v24, %v412_v25 }
 0x2cc   : > { %417 = vst.msk [vmem:[#allocation4] sm:$0xff] %vm290_vm0, %v415_v26 }
 0x2cd   : > { %v422_v28 = vpop.permute.xlu1 %421 }
 0x2ce   : > { %v424_v29 = vmul.f32 %v422_v28, %v418_v27 }
 0x2ff   : > { %v494_v30 = vpop.f32.mrf.mxu1 }
 0x300   : > { %v498_v31 = vadd.f32 %v494_v30, %v424_v29 }
 0x301   : > { %v912_v32 = vpop.f32.mrf.mxu1 }
 0x302   : > { %499 = vst.msk [vmem:[#allocation5] sm:$0xff] %vm293_vm1, %v498_v31 }
 0x303 PF: > { %502 = sbr.rel (%p1408_p10) target bundleno = 1454 (0x5ae), region = 56 }
 0x308   : > { %v505_v33 = vld [vmem:[%s244_s17] sm:$0xff]  ;;  %v1209_v34 = vmov 0.0   ;;  %vm1210_vm4 = vmmov 0   ;;  %v503_v35 = vld [vmem:[#allocation2] sm:$0xff]  ;;  %v585_v36 = vlaneseq  ;;  %v589_v38 = vstv %s1399_s11  ;;  %v592_v44 = vld [vmem:[#allocation3] sm:$0xff] }
 0x309   : > { %913 = vmatprep.subr.mxu0 %v1209_v34  ;;  %915 = vmatprep.mubr.msk.f32.mxu0 %vm1210_vm4, %v1209_v34  ;;  %vm593_vm6 = vcmask 64512   ;;  %v1211_v43 = vmov 0   ;;  %v507_v48 = vld [vmem:[%s253_s29] sm:$0xff]  ;;  %v612_v56 = vld [vmem:[#allocation4] sm:$0xff]  ;;  %v617_v60 = vld [vmem:[#allocation5] sm:$0xff] }
 0x30a   : > { %914 = vmatpush3.xpose.msk.msra.mxu0 %vm293_vm1, %v505_v33  ;;  %918 = vmatprep.subr.mxu1 %v1209_v34  ;;  %v586_v37 = vand.u32 127, %v585_v36 }
 0x30b   : > { %920 = vmatprep.mubr.msk.f32.mxu1 %vm1210_vm4, %v1209_v34  ;;  %1011 = vset.pattern.permute.xlu0 %v1211_v43 }
 0x30c   : > { %vm590_vm5 = vcmp.lt.s32.totalorder %v586_v37, %v589_v38  ;;  %1012 = vset.pattern.permute.xlu1 %v1211_v43  ;;  %919 = vmatpush3.msra.mxu1 %v507_v48 }
 0x30d   : > { %916 = vmatmul.mubr.msk.f32.vlgmr.msra.gmra.mxu0 %vm293_vm1, %v503_v35 }
 0x3cd   : > { %v581_v39 = vpop.f32.mrf.mxu0 }
 0x3ce   : > { %v591_v40 = vsel %vm590_vm5, %v581_v39, -1000000.0 }
 0x3cf   : > { %v917_v41 = vpop.f32.mrf.mxu0  ;;  %v594_v42 = vsel %vm593_vm6, %v591_v40, -inf }
 0x3d0   : > { %595 = vmax.xlane.f32.xlu0 %v594_v42 }
 0x459   : > { %v596_v45 = vpop.xlane.xlu0 %595 }
 0x45a   : > { %v597_v46 = vmax.f32 %v592_v44, %v596_v45 }
 0x45c   : > { %v598_v47 = vsub.f32 %v592_v44, %v597_v46  ;;  %699 = vst.msk [vmem:[#allocation3] sm:$0xff] %vm290_vm0, %v597_v46  ;;  %603 = vperm.xlu0 %1011, %v597_v46  }
 0x45e   : > { %v599_v53 = vmul.f32 1.442695, %v598_v47 }
 0x4d7   : > { %v604_v49 = vpop.permute.xlu0 %603 }
 0x4d8   : > { %v606_v50 = vsub.f32 %v591_v40, %v604_v49 }
 0x4da   : > { %v607_v51 = vmul.f32 1.442695, %v606_v50 }
 0x4dc   : > { %1013 = vpow2.f32 %v607_v51 }
 0x4dd   : > { %1015 = vpow2.f32 %v599_v53 }
 0x4e9   : > { %v1014_v52 = vpop.eup %1013 }
 0x4ea   : > { %921 = vmatmul.mubr.msk.f32.vlgmr.msra.gmra.mxu1 %vm593_vm6, %v1014_v52  ;;  %v609_v54 = vsel %vm593_vm6, %v1014_v52, 0.0  ;;  %v1016_v55 = vpop.eup %1015 }
 0x4eb   : > { %610 = vadd.xlane.f32.xlu1 %v609_v54  ;;  %v613_v57 = vmul.f32 %v1016_v55, %v612_v56 }
 0x4fc   : > { %620 = vperm.xlu1 %1012, %v1016_v55  }
 0x574   : > { %v611_v58 = vpop.xlane.xlu1 %610 }
 0x575   : > { %v614_v59 = vadd.f32 %v613_v57, %v611_v58 }
 0x577   : > { %616 = vst.msk [vmem:[#allocation4] sm:$0xff] %vm290_vm0, %v614_v59 }
 0x578   : > { %v621_v61 = vpop.permute.xlu1 %620 }
 0x579   : > { %v623_v62 = vmul.f32 %v621_v61, %v617_v60 }
 0x5aa   : > { %v693_v63 = vpop.f32.mrf.mxu1 }
 0x5ab   : > { %v697_v0 = vadd.f32 %v693_v63, %v623_v62 }
 0x5ac   : > { %v922_v1 = vpop.f32.mrf.mxu1 }
 0x5ad   : > { %698 = vst.msk [vmem:[#allocation5] sm:$0xff] %vm293_vm1, %v697_v0 }
 0x5ae PF: > { %v703_v2 = vld [vmem:[#allocation4] sm:$0xff]  ;;  %v1212_v3 = vmov 0   ;;  %s892_s12 = sshll.u32 %s1190_s21, 7  ;;  %s732_s2 = sshll.u32 %s285_s16, 4  ;;  %s733_s2 = int_to_ptr.vmem [resolvable:$true] %s732_s2 }
 0x5af   : > { %1017 = vset.pattern.permute.xlu0 %v1212_v3  ;;  %1018 = vrcp.f32 %v703_v2  ;;  %s730_s27 = scalar_lea.hbm %s1490_s4, %s892_s12  ;;  %s718_s22 = scalar_lea.sflag [#allocation10], %s1381_s15 }
 0x5b0   : > { %s1112_s28 = scalar_lea.vmem %s733_s2, 128  ;;  %s1213_s25 = smov [#allocation14]  }
 0x5b1   : > { %p1113_p13 = scmp.ne.s32.totalorder %s733_s2, %s1112_s28  ;;  %s1116_s21 = sshll.u32 %s1213_s25, 4  ;;  %s1117_s21 = int_to_ptr.vmem [resolvable:$false] %s1116_s21 }
 0x5b2   : > { %s1118_s8 = scalar_lea.vmem %s1117_s21, 256  ;;  %p1119_p2 = scmp.lt.s32.totalorder %s733_s2, %s1117_s21 }
 0x5b3   : > { %p1114_p12 = pnand %p1113_p13, %p1297_p9  ;;  %p1120_p5 = scmp.lt.s32.totalorder %s1118_s8, %s1112_s28 }
 0x5b4   : > { %v708_v8 = vld [vmem:[#allocation5] sm:$0xff] }
 0x5b5   : > { %p1115_p1 = pneg %p1114_p12  ;;  %p1121_p6 = por %p1120_p5, %p1119_p2 }
 0x5b7   : > { %p1122_p7 = pnand %p1121_p6, %p1115_p1 }
 0x5bc   : > { %v1019_v4 = vpop.eup %1018 }
 0x5bd   : > { %v705_v5 = vmul.f32 %v1019_v4, %v703_v2 }
 0x5bf   : > { %v706_v6 = vsub.f32 2.0, %v705_v5 }
 0x5c1   : > { %v707_v7 = vmul.f32 %v1019_v4, %v706_v6 }
 0x5c3   : > { %711 = vperm.xlu0 %1017, %v707_v7  }
 0x63e   : > { %v712_v9 = vpop.permute.xlu0 %711 }
 0x63f   : > { %v714_v10 = vmul.f32 %v712_v9, %v708_v8 }
 0x641   : > { %716 = vst.msk [vmem:[%s285_s16] sm:$0xff] %vm293_vm1, %v714_v10 }
 0x642   : > { %1125 = shalt.err (!%p1122_p7)
}
 0x643   : > { %s1126_s10 = scalar_lea.hbm %s730_s27, 128  ;;  %s1130_s14 = scalar_lea.hbm %s1490_s4, 256 }
 0x644   : > { %p1127_p0 = scmp.ne.s32.totalorder %s730_s27, %s1126_s10  ;;  %p1131_p4 = scmp.lt.s32.totalorder %s730_s27, %s1490_s4 }
 0x645   : > { %p1132_p10 = scmp.lt.s32.totalorder %s1130_s14, %s1126_s10 }
 0x646   : > { %p1128_p8 = pnand %p1127_p0, %p1297_p9 }
 0x647   : > { %p1133_p13 = por %p1132_p10, %p1131_p4 }
 0x648   : > { %p1129_p3 = pneg %p1128_p8 }
 0x64a   : > { %p1134_p12 = pnand %p1133_p13, %p1129_p3 }
 0x64c   : > { %1137 = shalt.err (!%p1134_p12)
}
 0x64d   : > { %929 = dma.vmem_to_hbm [thread:$0]  (%p1297_p9), %s733_s2, 128, %s730_s27, %s718_s22  }
 0x64e PF: > { %s744_s17 = sand.u32 1, %s1178_s18   ;;  %p1506_p1 = scmp.ge.s32.totalorder %s1198_s0, 2 }
 0x64f   : > { %s745_s11 = scalar_lea.sflag [#allocation10], %s744_s17 }
 0x650   : > { %p942_p2 = pnand %p1506_p1, %p1304_p11 }
 0x652   : > { %p943_p5 = pneg %p942_p2 }
 0x654   : > { %1173 = dma.done.wait (%p943_p5), %s745_s11, 128  }
 0x655   : > { %1175 = vsyncadd (%p943_p5), %s745_s11, 4294967168  ;;  %s27_s0 = sadd.s32 1, %s1198_s0   ;;  %s1507_s21 = sld [smem:[#allocation19_spill]] }
 0x656   : > { %p24_p6 = scmp.ge.s32.totalorder %s27_s0, 4   ;;  %s1508_s22 = sld [smem:[#allocation20_spill]] }
 0x657   : > { %s1509_s18 = smov %s1182_s19  ;;  %s1510_s19 = smov %s1186_s20 }
 0x658   : > { %s1511_s20 = smov %s1302_s5  ;;  %26 = sbr.rel (!%p24_p6) target bundleno = 14 (0xe), region = 121 }
 0x65d   :  { %750 = vsyncpa [#allocation9], 1 }
 0x65e   :  { %752 = vsyncpa [#allocation9 + $0x1], 1 }
 0x65f   :  { %753 = vsyncpa [#allocation12], 1 }
 0x660   :  { %755 = vsyncpa [#allocation12 + $0x1], 1 }
 0x661   :  { %756 = vsyncpa [#allocation10], 1 }
 0x662   :  { %758 = vsyncpa [#allocation10 + $0x1], 1 }

</bundles_post_ra>
